<compile_context>
chip_gen: v7x
topology: tpu7x:2x2x1
jax: 0.10.0
libtpu: 0.0.40
codegen_flags: <defaults>
</compile_context>

<pallas_src>
import functools
import math

import jax
import jax.numpy as jnp
import numpy as np
from jax import lax
from jax.experimental import pallas as pl
from jax.experimental.pallas import tpu as pltpu

LOG_STD_MIN = -4.0
LOG_STD_MAX = 2.0
EPS = 1e-6
HALF_LOG_2PI = 0.5 * math.log(2.0 * math.pi)

LANES = 128  # TPU lane width; packed output slab width


def _round_up(n, m):
    return ((n + m - 1) // m) * m


def _sac_actor_kernel(*refs, deterministic: bool, action_dim: int):
    A = action_dim
    n_noise = 0 if deterministic else A

    x_ref = refs[0]
    noise_refs = refs[1:1 + n_noise]  # A refs of shape (TB, 1), stochastic path only
    (w1_ref, b1_ref, w2_ref, b2_ref,
     w3c_ref, b3c_ref, w3p_ref, b3p_ref,
     scale_ref, loc_ref, out_ref) = refs[1 + n_noise:]

    # ---- MLP trunk: MXU matmuls with f32 accumulation, ReLU on the VPU ----
    x = x_ref[...]
    h = jnp.dot(x, w1_ref[...], preferred_element_type=jnp.float32) + b1_ref[...]
    h = jnp.maximum(h, 0.0)
    h = jnp.dot(h, w2_ref[...], preferred_element_type=jnp.float32) + b2_ref[...]
    h = jnp.maximum(h, 0.0)

    # ---- joint (mean | log_std) head: one 256-lane matmul, split at the vreg boundary ----
    heads = jnp.dot(h, w3c_ref[...], preferred_element_type=jnp.float32) + b3c_ref[...]
    mean = heads[:, :LANES]        # mean at lanes [0, A), zeros elsewhere
    log_std = heads[:, LANES:]     # log_std at lanes [0, A), zeros elsewhere

    # ---- pack head: same weight columns again, but placed at the packed-output lanes
    #      ([A, 2A) = mean, [2A, 3A) = log_std) so no cross-lane moves are needed ----
    pack = jnp.dot(h, w3p_ref[...], preferred_element_type=jnp.float32) + b3p_ref[...]

    tb = x.shape[0]
    lane = lax.broadcasted_iota(jnp.int32, (tb, LANES), 1)

    # One clamp + one exp serves both the compute lanes [0, A) and the packed std lanes [2A, 3A).
    log_std_all = jnp.where(lane < 2 * A, log_std, pack)
    log_std_all = jnp.clip(log_std_all, LOG_STD_MIN, LOG_STD_MAX)
    std_all = jnp.exp(log_std_all)          # pad lanes hold exp(0) = 1 -> safe divisor

    if deterministic:
        u = mean
        z = jnp.zeros_like(mean)            # (u - mean)/std == 0 exactly
    else:
        # eps: scatter the A noise columns ((TB, 1) each) onto lanes [0, A); zeros elsewhere.
        eps = jnp.zeros((tb, LANES), jnp.float32)
        for j, nref in enumerate(noise_refs):
            col = jnp.broadcast_to(nref[...], (tb, LANES))
            eps = jnp.where(lane == j, col, eps)
        u = mean + std_all * eps
        # Same formula as the reference / torch Normal.log_prob.  (The previous kernel used the
        # algebraic shortcut z == eps, which differs at ~1e-4 in f32 and failed the check.)
        z = (u - mean) / std_all

    y = jnp.tanh(u)
    scale = scale_ref[...]                  # (1, 128): scale at [0, A), 1.0 elsewhere
    action = y * scale + loc_ref[...]       # loc: loc at [0, A), 0 elsewhere

    # Normal log-prob + tanh/affine change-of-variables correction.
    logp = (-0.5 * z * z - log_std_all - HALF_LOG_2PI
            - jnp.log(scale * (1.0 - y * y) + EPS))
    logp = jnp.where(lane < A, logp, 0.0)   # drop the 128-lane padding before reducing
    log_prob = jnp.sum(logp, axis=-1, keepdims=True)

    # ---- single packed, lane-dense output slab (one unmasked full-vreg store):
    #      [0, A) = action, [A, 2A) = mean, [2A, 3A) = std, lane 3A = log_prob ----
    packed = jnp.where(lane < A, action, pack)                             # action | mean
    packed = jnp.where((lane >= 2 * A) & (lane < 3 * A), std_all, packed)  # std
    packed = jnp.where(lane == 3 * A,
                       jnp.broadcast_to(log_prob, packed.shape), packed)   # log_prob
    out_ref[...] = packed


def sac_actor_forward(params, x, noise=None, deterministic=False, batch_tile=1024):
    """SacActor forward.  `noise` is the N(0,1) eps used by rsample() (stochastic path only)."""
    B, obs_dim = x.shape
    A = params["scale"].shape[-1]
    if 3 * A + 1 > LANES:
        raise ValueError("packed output layout needs 3*action_dim + 1 <= 128")
    H = params["w1"].shape[-1]
    f32 = jnp.float32

    # ---- batch tile: largest multiple of 8 (or the full batch) up to batch_tile, capped so
    #      the grid has >= 2 steps when the batch allows it (v7x megacore / tile balance). ----
    if batch_tile >= B:
        TB = B
    else:
        TB = max(8, (batch_tile // 8) * 8)
    if B >= 16:
        TB = min(TB, _round_up(pl.cdiv(B, 2), 8))
    grid = (pl.cdiv(B, TB),)

    # ---- wrapper-side layout plumbing (tiny, one-time) ----
    w3 = params["w3"].astype(f32)
    b3 = params["b3"].astype(f32)
    w3m, w3s = w3[:, :A], w3[:, A:]
    b3m, b3s = b3[:, :A], b3[:, A:]

    # compute head (H, 256): mean cols at [0, A), log_std cols at [128, 128+A)
    w3c = jnp.zeros((H, 2 * LANES), f32).at[:, :A].set(w3m).at[:, LANES:LANES + A].set(w3s)
    b3c = jnp.zeros((1, 2 * LANES), f32).at[:, :A].set(b3m).at[:, LANES:LANES + A].set(b3s)
    # pack head (H, 128): mean cols duplicated at [A, 2A), log_std cols at [2A, 3A)
    w3p = jnp.zeros((H, LANES), f32).at[:, A:2 * A].set(w3m).at[:, 2 * A:3 * A].set(w3s)
    b3p = jnp.zeros((1, LANES), f32).at[:, A:2 * A].set(b3m).at[:, 2 * A:3 * A].set(b3s)

    scale_p = jnp.ones((1, LANES), f32).at[:, :A].set(params["scale"].astype(f32))
    loc_p = jnp.zeros((1, LANES), f32).at[:, :A].set(params["loc"].astype(f32))

    operands = [x.astype(f32)]
    in_specs = [pl.BlockSpec((TB, obs_dim), lambda i: (i, 0))]

    if not deterministic:
        if noise is None:
            raise ValueError("noise (eps ~ N(0,1)) is required when deterministic=False")
        noise = noise.astype(f32)
        for j in range(A):
            operands.append(noise[:, j:j + 1])                    # (B, 1): 4 useful B/row each
            in_specs.append(pl.BlockSpec((TB, 1), lambda i: (i, 0)))

    weight_ops = [params["w1"].astype(f32), params["b1"].astype(f32),
                  params["w2"].astype(f32), params["b2"].astype(f32),
                  w3c, b3c, w3p, b3p, scale_p, loc_p]
    operands += weight_ops
    # constant index_map -> weights are DMA'd once and stay resident in VMEM across grid steps
    in_specs += [pl.BlockSpec(op.shape, lambda i: (0, 0)) for op in weight_ops]

    kernel = functools.partial(_sac_actor_kernel, deterministic=deterministic, action_dim=A)

    packed = pl.pallas_call(
        kernel,
        out_shape=jax.ShapeDtypeStruct((B, LANES), f32),
        grid=grid,
        in_specs=in_specs,
        out_specs=pl.BlockSpec((TB, LANES), lambda i: (i, 0)),
        compiler_params=pltpu.CompilerParams(dimension_semantics=("parallel",)),
    )(*operands)

    # wrapper slices the packed lane ranges; padding lanes are discarded
    action = packed[:, :A]
    log_prob = packed[:, 3 * A:3 * A + 1]
    stats = {"mean": packed[:, A:2 * A], "std": packed[:, 2 * A:3 * A]}
    return action, log_prob, stats


def init_params(key, obs_dim, hidden, action_dim, low, high):
    """Deterministic PyTorch-style Linear init: U(-1/sqrt(fan_in), 1/sqrt(fan_in))."""
    ks = jax.random.split(key, 6)

    def lin(kw, kb, fan_in, fan_out):
        bound = 1.0 / math.sqrt(fan_in)
        w = jax.random.uniform(kw, (fan_in, fan_out), jnp.float32, -bound, bound)
        b = jax.random.uniform(kb, (1, fan_out), jnp.float32, -bound, bound)
        return w, b

    w1, b1 = lin(ks[0], ks[1], obs_dim, hidden)
    w2, b2 = lin(ks[2], ks[3], hidden, hidden)
    w3, b3 = lin(ks[4], ks[5], hidden, 2 * action_dim)  # joint (mean, log_std) head

    scale = jnp.asarray((high - low) / 2.0, jnp.float32).reshape(1, action_dim)
    loc = jnp.asarray((high + low) / 2.0, jnp.float32).reshape(1, action_dim)
    return dict(w1=w1, b1=b1, w2=w2, b2=b2, w3=w3, b3=b3, scale=scale, loc=loc)


def _reference(params, x, noise, deterministic):
    """Pure-JAX reference mirroring the PyTorch module's formulas."""
    h = jnp.maximum(x @ params["w1"] + params["b1"], 0.0)
    h = jnp.maximum(h @ params["w2"] + params["b2"], 0.0)
    out = h @ params["w3"] + params["b3"]
    A = params["scale"].shape[-1]
    mean, log_std = out[:, :A], out[:, A:]
    log_std = jnp.clip(log_std, LOG_STD_MIN, LOG_STD_MAX)
    std = jnp.exp(log_std)
    u = mean if deterministic else mean + std * noise
    y = jnp.tanh(u)
    action = y * params["scale"] + params["loc"]
    logp = -0.5 * ((u - mean) / std) ** 2 - log_std - HALF_LOG_2PI
    logp = logp - jnp.log(params["scale"] * (1.0 - y * y) + EPS)
    return action, jnp.sum(logp, -1, keepdims=True), mean, std


def _check(params, x, noise, deterministic):
    action, log_prob, stats = sac_actor_forward(
        params, x, noise if not deterministic else None, deterministic=deterministic
    )
    jax.block_until_ready((action, log_prob, stats["mean"], stats["std"]))
    ra, rl, rm, rs = _reference(params, x, noise, deterministic)
    np.testing.assert_allclose(np.asarray(action), np.asarray(ra), rtol=1e-5, atol=1e-5)
    np.testing.assert_allclose(np.asarray(stats["mean"]), np.asarray(rm), rtol=1e-5, atol=1e-5)
    np.testing.assert_allclose(np.asarray(stats["std"]), np.asarray(rs), rtol=1e-5, atol=1e-5)
    # log_prob contains a catastrophically-cancelling (u - mean)/std term, so ulp-level
    # differences between the MXU and XLA matmul paths for `mean` get amplified; 1e-4 is the
    # realistic agreement level for the summed log-density.
    np.testing.assert_allclose(np.asarray(log_prob), np.asarray(rl), rtol=1e-4, atol=1e-4)


if __name__ == "__main__":
    OBS_DIM, HIDDEN, ACTION_DIM = 8, 32, 4
    low = np.full((ACTION_DIM,), -2.0, np.float32)
    high = np.full((ACTION_DIM,), 2.0, np.float32)

    root = jax.random.PRNGKey(0)
    kp, kx, kn, kx2, kn2 = jax.random.split(root, 5)

    params = init_params(kp, OBS_DIM, HIDDEN, ACTION_DIM, low, high)

    # small shapes consistent with the module (B=2) — stochastic and deterministic paths
    x = jax.random.normal(kx, (2, OBS_DIM), jnp.float32)
    noise = jax.random.normal(kn, (2, ACTION_DIM), jnp.float32)  # eps for rsample()
    _check(params, x, noise, deterministic=False)
    _check(params, x, noise, deterministic=True)

    # larger batch: multiple grid steps + a partial last tile
    xb = jax.random.normal(kx2, (600, OBS_DIM), jnp.float32)
    nb = jax.random.normal(kn2, (600, ACTION_DIM), jnp.float32)
    _check(params, xb, nb, deterministic=False)
    _check(params, xb, nb, deterministic=True)

    print("KERNEL_OK")
</pallas_src>

<mosaic_0001>
module attributes {stable_mosaic.version = 11 : i64} {
  func.func @_sac_actor_kernel(%arg0: i32, %arg1: memref<2x8xf32, #tpu.memory_space<vmem>>, %arg2: memref<2x1xf32, #tpu.memory_space<vmem>>, %arg3: memref<2x1xf32, #tpu.memory_space<vmem>>, %arg4: memref<2x1xf32, #tpu.memory_space<vmem>>, %arg5: memref<2x1xf32, #tpu.memory_space<vmem>>, %arg6: memref<8x32xf32, #tpu.memory_space<vmem>>, %arg7: memref<1x32xf32, #tpu.memory_space<vmem>>, %arg8: memref<32x32xf32, #tpu.memory_space<vmem>>, %arg9: memref<1x32xf32, #tpu.memory_space<vmem>>, %arg10: memref<32x256xf32, #tpu.memory_space<vmem>>, %arg11: memref<1x256xf32, #tpu.memory_space<vmem>>, %arg12: memref<32x128xf32, #tpu.memory_space<vmem>>, %arg13: memref<1x128xf32, #tpu.memory_space<vmem>>, %arg14: memref<1x128xf32, #tpu.memory_space<vmem>>, %arg15: memref<1x128xf32, #tpu.memory_space<vmem>>, %arg16: memref<2x128xf32, #tpu.memory_space<vmem>>) attributes {dimension_semantics = [#tpu.dimension_semantics<parallel>], iteration_bounds = array<i64: 1>, scalar_prefetch = 0 : i64, scratch_operands = 0 : i64, tpu.core_type = #tpu.core_type<tc>, window_params = [{transform_indices = @transform_0, window_bounds = array<i64: 2, 8>}, {transform_indices = @transform_1, window_bounds = array<i64: 2, 1>}, {transform_indices = @transform_2, window_bounds = array<i64: 2, 1>}, {transform_indices = @transform_3, window_bounds = array<i64: 2, 1>}, {transform_indices = @transform_4, window_bounds = array<i64: 2, 1>}, {pipeline_mode = #tpu.pipeline_mode<synchronous>, transform_indices = @transform_5, window_bounds = array<i64: 8, 32>}, {pipeline_mode = #tpu.pipeline_mode<synchronous>, transform_indices = @transform_6, window_bounds = array<i64: 1, 32>}, {pipeline_mode = #tpu.pipeline_mode<synchronous>, transform_indices = @transform_7, window_bounds = array<i64: 32, 32>}, {pipeline_mode = #tpu.pipeline_mode<synchronous>, transform_indices = @transform_8, window_bounds = array<i64: 1, 32>}, {pipeline_mode = #tpu.pipeline_mode<synchronous>, transform_indices = @transform_9, window_bounds = array<i64: 32, 256>}, {pipeline_mode = #tpu.pipeline_mode<synchronous>, transform_indices = @transform_10, window_bounds = array<i64: 1, 256>}, {pipeline_mode = #tpu.pipeline_mode<synchronous>, transform_indices = @transform_11, window_bounds = array<i64: 32, 128>}, {pipeline_mode = #tpu.pipeline_mode<synchronous>, transform_indices = @transform_12, window_bounds = array<i64: 1, 128>}, {pipeline_mode = #tpu.pipeline_mode<synchronous>, transform_indices = @transform_13, window_bounds = array<i64: 1, 128>}, {pipeline_mode = #tpu.pipeline_mode<synchronous>, transform_indices = @transform_14, window_bounds = array<i64: 1, 128>}, {transform_indices = @transform_15, window_bounds = array<i64: 2, 128>}]} {
    %c0 = arith.constant 0 : index
    %c0_0 = arith.constant 0 : index
    %0 = vector.load %arg1[%c0, %c0_0] : memref<2x8xf32, #tpu.memory_space<vmem>>, vector<2x8xf32>
    %c0_1 = arith.constant 0 : index
    %c0_2 = arith.constant 0 : index
    %1 = vector.load %arg6[%c0_1, %c0_2] : memref<8x32xf32, #tpu.memory_space<vmem>>, vector<8x32xf32>
    %cst = arith.constant dense<0.000000e+00> : vector<2x32xf32>
    %2 = tpu.matmul %0, %1, %cst {dimension_numbers = #tpu.dot_dimension_numbers<[1], [0], [0], [1], [0, 0, 1, 1], [], []>} : vector<2x8xf32>, vector<8x32xf32>, vector<2x32xf32> -> vector<2x32xf32>
    %c0_3 = arith.constant 0 : index
    %c0_4 = arith.constant 0 : index
    %3 = vector.load %arg7[%c0_3, %c0_4] : memref<1x32xf32, #tpu.memory_space<vmem>>, vector<1x32xf32>
    %4 = vector.broadcast %3 : vector<1x32xf32> to vector<2x32xf32>
    %5 = arith.addf %2, %4 : vector<2x32xf32>
    %cst_5 = arith.constant 0.000000e+00 : f32
    %6 = vector.broadcast %cst_5 : f32 to vector<2x32xf32>
    %7 = arith.maximumf %5, %6 : vector<2x32xf32>
    %c0_6 = arith.constant 0 : index
    %c0_7 = arith.constant 0 : index
    %8 = vector.load %arg8[%c0_6, %c0_7] : memref<32x32xf32, #tpu.memory_space<vmem>>, vector<32x32xf32>
    %cst_8 = arith.constant dense<0.000000e+00> : vector<2x32xf32>
    %9 = tpu.matmul %7, %8, %cst_8 {dimension_numbers = #tpu.dot_dimension_numbers<[1], [0], [0], [1], [0, 0, 1, 1], [], []>} : vector<2x32xf32>, vector<32x32xf32>, vector<2x32xf32> -> vector<2x32xf32>
    %c0_9 = arith.constant 0 : index
    %c0_10 = arith.constant 0 : index
    %10 = vector.load %arg9[%c0_9, %c0_10] : memref<1x32xf32, #tpu.memory_space<vmem>>, vector<1x32xf32>
    %11 = vector.broadcast %10 : vector<1x32xf32> to vector<2x32xf32>
    %12 = arith.addf %9, %11 : vector<2x32xf32>
    %cst_11 = arith.constant 0.000000e+00 : f32
    %13 = vector.broadcast %cst_11 : f32 to vector<2x32xf32>
    %14 = arith.maximumf %12, %13 : vector<2x32xf32>
    %c0_12 = arith.constant 0 : index
    %c0_13 = arith.constant 0 : index
    %15 = vector.load %arg10[%c0_12, %c0_13] : memref<32x256xf32, #tpu.memory_space<vmem>>, vector<32x256xf32>
    %cst_14 = arith.constant dense<0.000000e+00> : vector<2x256xf32>
    %16 = tpu.matmul %14, %15, %cst_14 {dimension_numbers = #tpu.dot_dimension_numbers<[1], [0], [0], [1], [0, 0, 1, 1], [], []>} : vector<2x32xf32>, vector<32x256xf32>, vector<2x256xf32> -> vector<2x256xf32>
    %c0_15 = arith.constant 0 : index
    %c0_16 = arith.constant 0 : index
    %17 = vector.load %arg11[%c0_15, %c0_16] : memref<1x256xf32, #tpu.memory_space<vmem>>, vector<1x256xf32>
    %18 = vector.broadcast %17 : vector<1x256xf32> to vector<2x256xf32>
    %19 = arith.addf %16, %18 : vector<2x256xf32>
    %20 = vector.extract_strided_slice %19 {offsets = [0, 0], sizes = [2, 128], strides = [1, 1]} : vector<2x256xf32> to vector<2x128xf32>
    %21 = vector.extract_strided_slice %19 {offsets = [0, 128], sizes = [2, 128], strides = [1, 1]} : vector<2x256xf32> to vector<2x128xf32>
    %c0_17 = arith.constant 0 : index
    %c0_18 = arith.constant 0 : index
    %22 = vector.load %arg12[%c0_17, %c0_18] : memref<32x128xf32, #tpu.memory_space<vmem>>, vector<32x128xf32>
    %cst_19 = arith.constant dense<0.000000e+00> : vector<2x128xf32>
    %23 = tpu.matmul %14, %22, %cst_19 {dimension_numbers = #tpu.dot_dimension_numbers<[1], [0], [0], [1], [0, 0, 1, 1], [], []>} : vector<2x32xf32>, vector<32x128xf32>, vector<2x128xf32> -> vector<2x128xf32>
    %c0_20 = arith.constant 0 : index
    %c0_21 = arith.constant 0 : index
    %24 = vector.load %arg13[%c0_20, %c0_21] : memref<1x128xf32, #tpu.memory_space<vmem>>, vector<1x128xf32>
    %25 = vector.broadcast %24 : vector<1x128xf32> to vector<2x128xf32>
    %26 = arith.addf %23, %25 : vector<2x128xf32>
    %27 = tpu.iota {dimensions = array<i32: 1>} : vector<2x128xi32>
    %c8_i32 = arith.constant 8 : i32
    %28 = vector.broadcast %c8_i32 : i32 to vector<2x128xi32>
    %29 = arith.cmpi slt, %27, %28 : vector<2x128xi32>
    %30 = arith.select %29, %21, %26 : vector<2x128xi1>, vector<2x128xf32>
    %cst_22 = arith.constant -4.000000e+00 : f32
    %cst_23 = arith.constant 2.000000e+00 : f32
    %31 = vector.broadcast %cst_22 : f32 to vector<2x128xf32>
    %32 = arith.maximumf %31, %30 : vector<2x128xf32>
    %33 = vector.broadcast %cst_23 : f32 to vector<2x128xf32>
    %34 = arith.minimumf %33, %32 : vector<2x128xf32>
    %35 = math.exp %34 : vector<2x128xf32>
    %cst_24 = arith.constant 0.000000e+00 : f32
    %36 = vector.broadcast %cst_24 : f32 to vector<2x128xf32>
    %c0_25 = arith.constant 0 : index
    %c0_26 = arith.constant 0 : index
    %37 = vector.load %arg2[%c0_25, %c0_26] : memref<2x1xf32, #tpu.memory_space<vmem>>, vector<2x1xf32>
    %38 = vector.shape_cast %37 : vector<2x1xf32> to vector<2x1xf32>
    %39 = vector.broadcast %38 : vector<2x1xf32> to vector<2x128xf32>
    %c0_i32 = arith.constant 0 : i32
    %40 = vector.broadcast %c0_i32 : i32 to vector<2x128xi32>
    %41 = arith.cmpi eq, %27, %40 : vector<2x128xi32>
    %42 = arith.select %41, %39, %36 : vector<2x128xi1>, vector<2x128xf32>
    %c0_27 = arith.constant 0 : index
    %c0_28 = arith.constant 0 : index
    %43 = vector.load %arg3[%c0_27, %c0_28] : memref<2x1xf32, #tpu.memory_space<vmem>>, vector<2x1xf32>
    %44 = vector.shape_cast %43 : vector<2x1xf32> to vector<2x1xf32>
    %45 = vector.broadcast %44 : vector<2x1xf32> to vector<2x128xf32>
    %c1_i32 = arith.constant 1 : i32
    %46 = vector.broadcast %c1_i32 : i32 to vector<2x128xi32>
    %47 = arith.cmpi eq, %27, %46 : vector<2x128xi32>
    %48 = arith.select %47, %45, %42 : vector<2x128xi1>, vector<2x128xf32>
    %c0_29 = arith.constant 0 : index
    %c0_30 = arith.constant 0 : index
    %49 = vector.load %arg4[%c0_29, %c0_30] : memref<2x1xf32, #tpu.memory_space<vmem>>, vector<2x1xf32>
    %50 = vector.shape_cast %49 : vector<2x1xf32> to vector<2x1xf32>
    %51 = vector.broadcast %50 : vector<2x1xf32> to vector<2x128xf32>
    %c2_i32 = arith.constant 2 : i32
    %52 = vector.broadcast %c2_i32 : i32 to vector<2x128xi32>
    %53 = arith.cmpi eq, %27, %52 : vector<2x128xi32>
    %54 = arith.select %53, %51, %48 : vector<2x128xi1>, vector<2x128xf32>
    %c0_31 = arith.constant 0 : index
    %c0_32 = arith.constant 0 : index
    %55 = vector.load %arg5[%c0_31, %c0_32] : memref<2x1xf32, #tpu.memory_space<vmem>>, vector<2x1xf32>
    %56 = vector.shape_cast %55 : vector<2x1xf32> to vector<2x1xf32>
    %57 = vector.broadcast %56 : vector<2x1xf32> to vector<2x128xf32>
    %c3_i32 = arith.constant 3 : i32
    %58 = vector.broadcast %c3_i32 : i32 to vector<2x128xi32>
    %59 = arith.cmpi eq, %27, %58 : vector<2x128xi32>
    %60 = arith.select %59, %57, %54 : vector<2x128xi1>, vector<2x128xf32>
    %61 = arith.mulf %35, %60 : vector<2x128xf32>
    %62 = arith.addf %20, %61 : vector<2x128xf32>
    %63 = arith.subf %62, %20 : vector<2x128xf32>
    %64 = arith.divf %63, %35 : vector<2x128xf32>
    %65 = math.tanh %62 : vector<2x128xf32>
    %c0_33 = arith.constant 0 : index
    %c0_34 = arith.constant 0 : index
    %66 = vector.load %arg14[%c0_33, %c0_34] : memref<1x128xf32, #tpu.memory_space<vmem>>, vector<1x128xf32>
    %67 = vector.broadcast %66 : vector<1x128xf32> to vector<2x128xf32>
    %68 = arith.mulf %65, %67 : vector<2x128xf32>
    %c0_35 = arith.constant 0 : index
    %c0_36 = arith.constant 0 : index
    %69 = vector.load %arg15[%c0_35, %c0_36] : memref<1x128xf32, #tpu.memory_space<vmem>>, vector<1x128xf32>
    %70 = vector.broadcast %69 : vector<1x128xf32> to vector<2x128xf32>
    %71 = arith.addf %68, %70 : vector<2x128xf32>
    %cst_37 = arith.constant -5.000000e-01 : f32
    %72 = vector.broadcast %cst_37 : f32 to vector<2x128xf32>
    %73 = arith.mulf %72, %64 : vector<2x128xf32>
    %74 = arith.mulf %73, %64 : vector<2x128xf32>
    %75 = arith.subf %74, %34 : vector<2x128xf32>
    %cst_38 = arith.constant 0.918938517 : f32
    %76 = vector.broadcast %cst_38 : f32 to vector<2x128xf32>
    %77 = arith.subf %75, %76 : vector<2x128xf32>
    %78 = arith.mulf %65, %65 : vector<2x128xf32>
    %cst_39 = arith.constant 1.000000e+00 : f32
    %79 = vector.broadcast %cst_39 : f32 to vector<2x128xf32>
    %80 = arith.subf %79, %78 : vector<2x128xf32>
    %81 = vector.broadcast %66 : vector<1x128xf32> to vector<2x128xf32>
    %82 = arith.mulf %81, %80 : vector<2x128xf32>
    %cst_40 = arith.constant 9.99999997E-7 : f32
    %83 = vector.broadcast %cst_40 : f32 to vector<2x128xf32>
    %84 = arith.addf %82, %83 : vector<2x128xf32>
    %85 = math.log %84 : vector<2x128xf32>
    %86 = arith.subf %77, %85 : vector<2x128xf32>
    %c4_i32 = arith.constant 4 : i32
    %87 = vector.broadcast %c4_i32 : i32 to vector<2x128xi32>
    %88 = arith.cmpi slt, %27, %87 : vector<2x128xi32>
    %cst_41 = arith.constant 0.000000e+00 : f32
    %89 = vector.broadcast %cst_41 : f32 to vector<2x128xf32>
    %90 = arith.select %88, %86, %89 : vector<2x128xi1>, vector<2x128xf32>
    %cst_42 = arith.constant dense<0.000000e+00> : vector<2xf32>
    %91 = vector.multi_reduction <add>, %90, %cst_42 [1] : vector<2x128xf32> to vector<2xf32>
    %92 = vector.shape_cast %91 : vector<2xf32> to vector<2x1xf32>
    %c4_i32_43 = arith.constant 4 : i32
    %93 = vector.broadcast %c4_i32_43 : i32 to vector<2x128xi32>
    %94 = arith.cmpi slt, %27, %93 : vector<2x128xi32>
    %95 = arith.select %94, %71, %26 : vector<2x128xi1>, vector<2x128xf32>
    %c8_i32_44 = arith.constant 8 : i32
    %96 = vector.broadcast %c8_i32_44 : i32 to vector<2x128xi32>
    %97 = arith.cmpi sge, %27, %96 : vector<2x128xi32>
    %c12_i32 = arith.constant 12 : i32
    %98 = vector.broadcast %c12_i32 : i32 to vector<2x128xi32>
    %99 = arith.cmpi slt, %27, %98 : vector<2x128xi32>
    %100 = arith.andi %97, %99 : vector<2x128xi1>
    %101 = arith.select %100, %35, %95 : vector<2x128xi1>, vector<2x128xf32>
    %c12_i32_45 = arith.constant 12 : i32
    %102 = vector.broadcast %c12_i32_45 : i32 to vector<2x128xi32>
    %103 = arith.cmpi eq, %27, %102 : vector<2x128xi32>
    %104 = vector.shape_cast %92 : vector<2x1xf32> to vector<2x1xf32>
    %105 = vector.broadcast %104 : vector<2x1xf32> to vector<2x128xf32>
    %106 = arith.select %103, %105, %101 : vector<2x128xi1>, vector<2x128xf32>
    %c0_46 = arith.constant 0 : index
    %c0_47 = arith.constant 0 : index
    %107 = vector.load %arg16[%c0_46, %c0_47] : memref<2x128xf32, #tpu.memory_space<vmem>>, vector<2x128xf32>
    tpu.vector_store %arg16[%c0_46, %c0_47], %106 {strides = array<i32>} : memref<2x128xf32, #tpu.memory_space<vmem>>, vector<2x128xf32>,
    return
  }
  func.func @transform_0(%arg0: i32) -> (i32, i32) {
    %c0_i32 = arith.constant 0 : i32
    %c0_i32_0 = arith.constant 0 : i32
    return %arg0, %c0_i32 : i32, i32
  }
  func.func @transform_1(%arg0: i32) -> (i32, i32) {
    %c0_i32 = arith.constant 0 : i32
    %c0_i32_0 = arith.constant 0 : i32
    return %arg0, %c0_i32 : i32, i32
  }
  func.func @transform_2(%arg0: i32) -> (i32, i32) {
    %c0_i32 = arith.constant 0 : i32
    %c0_i32_0 = arith.constant 0 : i32
    return %arg0, %c0_i32 : i32, i32
  }
  func.func @transform_3(%arg0: i32) -> (i32, i32) {
    %c0_i32 = arith.constant 0 : i32
    %c0_i32_0 = arith.constant 0 : i32
    return %arg0, %c0_i32 : i32, i32
  }
  func.func @transform_4(%arg0: i32) -> (i32, i32) {
    %c0_i32 = arith.constant 0 : i32
    %c0_i32_0 = arith.constant 0 : i32
    return %arg0, %c0_i32 : i32, i32
  }
  func.func @transform_5(%arg0: i32) -> (i32, i32) {
    %c0_i32 = arith.constant 0 : i32
    %c0_i32_0 = arith.constant 0 : i32
    %c0_i32_1 = arith.constant 0 : i32
    return %c0_i32, %c0_i32_0 : i32, i32
  }
  func.func @transform_6(%arg0: i32) -> (i32, i32) {
    %c0_i32 = arith.constant 0 : i32
    %c0_i32_0 = arith.constant 0 : i32
    %c0_i32_1 = arith.constant 0 : i32
    return %c0_i32, %c0_i32_0 : i32, i32
  }
  func.func @transform_7(%arg0: i32) -> (i32, i32) {
    %c0_i32 = arith.constant 0 : i32
    %c0_i32_0 = arith.constant 0 : i32
    %c0_i32_1 = arith.constant 0 : i32
    return %c0_i32, %c0_i32_0 : i32, i32
  }
  func.func @transform_8(%arg0: i32) -> (i32, i32) {
    %c0_i32 = arith.constant 0 : i32
    %c0_i32_0 = arith.constant 0 : i32
    %c0_i32_1 = arith.constant 0 : i32
    return %c0_i32, %c0_i32_0 : i32, i32
  }
  func.func @transform_9(%arg0: i32) -> (i32, i32) {
    %c0_i32 = arith.constant 0 : i32
    %c0_i32_0 = arith.constant 0 : i32
    %c0_i32_1 = arith.constant 0 : i32
    return %c0_i32, %c0_i32_0 : i32, i32
  }
  func.func @transform_10(%arg0: i32) -> (i32, i32) {
    %c0_i32 = arith.constant 0 : i32
    %c0_i32_0 = arith.constant 0 : i32
    %c0_i32_1 = arith.constant 0 : i32
    return %c0_i32, %c0_i32_0 : i32, i32
  }
  func.func @transform_11(%arg0: i32) -> (i32, i32) {
    %c0_i32 = arith.constant 0 : i32
    %c0_i32_0 = arith.constant 0 : i32
    %c0_i32_1 = arith.constant 0 : i32
    return %c0_i32, %c0_i32_0 : i32, i32
  }
  func.func @transform_12(%arg0: i32) -> (i32, i32) {
    %c0_i32 = arith.constant 0 : i32
    %c0_i32_0 = arith.constant 0 : i32
    %c0_i32_1 = arith.constant 0 : i32
    return %c0_i32, %c0_i32_0 : i32, i32
  }
  func.func @transform_13(%arg0: i32) -> (i32, i32) {
    %c0_i32 = arith.constant 0 : i32
    %c0_i32_0 = arith.constant 0 : i32
    %c0_i32_1 = arith.constant 0 : i32
    return %c0_i32, %c0_i32_0 : i32, i32
  }
  func.func @transform_14(%arg0: i32) -> (i32, i32) {
    %c0_i32 = arith.constant 0 : i32
    %c0_i32_0 = arith.constant 0 : i32
    %c0_i32_1 = arith.constant 0 : i32
    return %c0_i32, %c0_i32_0 : i32, i32
  }
  func.func @transform_15(%arg0: i32) -> (i32, i32) {
    %c0_i32 = arith.constant 0 : i32
    %c0_i32_0 = arith.constant 0 : i32
    return %arg0, %c0_i32 : i32, i32
  }
}

</mosaic_0001>

<bundles_post_ra>
// kernel: tpu_custom_call.1
= control target key start
LH: loop header
LB: loop body
LE: loop exit
PB: predicated region body
PF: predicated region fallthrough
CT: control target
= control target key end

     0   :  { %s931_s0 = inlined_call_operand.hbm [shape: f32[2,8], index: 0, kind: input, shape index: {}]   ;;  %s932_s1 = inlined_call_operand.vmem [shape: f32[2,1], index: 1, kind: input, shape index: {}]   ;;  %s933_s2 = inlined_call_operand.vmem [shape: f32[2,1], index: 2, kind: input, shape index: {}]   ;;  %s934_s3 = inlined_call_operand.vmem [shape: f32[2,1], index: 3, kind: input, shape index: {}]   ;;  %s935_s4 = inlined_call_operand.vmem [shape: f32[2,1], index: 4, kind: input, shape index: {}]   ;;  %s936_s5 = inlined_call_operand.vmem [shape: f32[8,32], index: 5, kind: input, shape index: {}]   ;;  %s937_s6 = inlined_call_operand.vmem [shape: f32[1,32], index: 6, kind: input, shape index: {}]   ;;  %s938_s7 = inlined_call_operand.vmem [shape: f32[32,32], index: 7, kind: input, shape index: {}]   ;;  %s939_s8 = inlined_call_operand.vmem [shape: f32[1,32], index: 8, kind: input, shape index: {}]   ;;  %s940_s9 = inlined_call_operand.hbm [shape: f32[32,256], index: 9, kind: input, shape index: {}]   ;;  %s941_s10 = inlined_call_operand.vmem [shape: f32[1,256], index: 10, kind: input, shape index: {}]   ;;  %s942_s11 = inlined_call_operand.hbm [shape: f32[32,128], index: 11, kind: input, shape index: {}]   ;;  %s943_s12 = inlined_call_operand.vmem [shape: f32[1,128], index: 12, kind: input, shape index: {}]   ;;  %s944_s13 = inlined_call_operand.vmem [shape: f32[1,128], index: 13, kind: input, shape index: {}]   ;;  %s945_s14 = inlined_call_operand.vmem [shape: f32[1,128], index: 14, kind: input, shape index: {}]   ;;  %s946_s15 = inlined_call_operand.hbm [shape: f32[2,128], index: 15, kind: output, shape index: {}]  }
   0x1   :  { %948 = sst [smem:[#allocation12_spill]] %s946_s15 }
   0x2   :  { %20 = vsyncpa [#allocation3], 0 }
   0x3   :  { %21 = vsyncpa [#allocation6], 0 }
   0x4   :  { %22 = vsyncpa [#allocation4], 0  ;;  %s723_s18 = smov [#allocation5]   ;;  %s629_s22 = scalar_lea.hbm %s940_s9, 1024 }
   0x5   :  { %s54_s19 = sshll.u32 %s723_s18, 4  ;;  %p630_p0 = scmp.ne.s32.totalorder %s940_s9, %s629_s22  ;;  %s55_s19 = int_to_ptr.vmem [resolvable:$true] %s54_s19 }
   0x6   :  { %p633_p1 = scmp.lt.u32.totalorder %s629_s22, %s940_s9 }
   0x8   :  { %p635_p2 = pnand %p633_p1, %p630_p0 }
   0xa   :  { %638 = shalt.err (!%p635_p2)
}
   0xb   :  { %s639_s27 = scalar_lea.vmem %s55_s19, 1024  ;;  %p644_p4 = scmp.lt.s32.totalorder %s55_s19, %s55_s19 }
   0xc   :  { %p640_p3 = scmp.ne.s32.totalorder %s55_s19, %s639_s27  ;;  %p645_p5 = scmp.lt.s32.totalorder %s639_s27, %s639_s27 }
   0xe   :  { %p646_p6 = por %p645_p5, %p644_p4 }
  0x10   :  { %p647_p7 = pnand %p646_p6, %p640_p3 }
  0x12   :  { %650 = shalt.err (!%p647_p7)
}
  0x13   :  { %s724_s28 = smov 256   ;;  %s725_s29 = smov 16  }
  0x14   :  { %60 = dma.hbm_to_vmem [thread:$0]  %s940_s9, 1024, %s55_s19, [#allocation6], %s724_s28, %s724_s28, %s725_s29  }
  0x15   :  { %s726_s17 = smov [#allocation2]   ;;  %s727_s20 = smov [#allocation7]  }
  0x16   :  { %s29_s18 = sshll.u32 %s726_s17, 4  ;;  %s68_s21 = sshll.u32 %s727_s20, 4  ;;  %s30_s18 = int_to_ptr.vmem [resolvable:$true] %s29_s18  ;;  %s69_s21 = int_to_ptr.vmem [resolvable:$true] %s68_s21 }
  0x17   :  { %s651_s24 = scalar_lea.hbm %s931_s0, 32 }
  0x18   :  { %p652_p8 = scmp.ne.s32.totalorder %s931_s0, %s651_s24  ;;  %p655_p9 = scmp.lt.u32.totalorder %s651_s24, %s931_s0 }
  0x1a   :  { %p657_p10 = pnand %p655_p9, %p652_p8 }
  0x1c   :  { %660 = shalt.err (!%p657_p10)
}
  0x1d   :  { %s661_s9 = scalar_lea.vmem %s30_s18, 32  ;;  %p666_p12 = scmp.lt.s32.totalorder %s30_s18, %s30_s18 }
  0x1e   :  { %p662_p11 = scmp.ne.s32.totalorder %s30_s18, %s661_s9  ;;  %p667_p13 = scmp.lt.s32.totalorder %s661_s9, %s661_s9 }
  0x20   :  { %p668_p0 = por %p667_p13, %p666_p12 }
  0x22   :  { %p669_p1 = pnand %p668_p0, %p662_p11 }
  0x24   :  { %672 = shalt.err (!%p669_p1)
}
  0x25   :  { %32 = dma.hbm_to_vmem [thread:$0]  %s931_s0, 32, %s30_s18, [#allocation3]  }
  0x26   :  { %s673_s16 = scalar_lea.hbm %s942_s11, 512 }
  0x27   :  { %p674_p2 = scmp.ne.s32.totalorder %s942_s11, %s673_s16  ;;  %p677_p3 = scmp.lt.u32.totalorder %s673_s16, %s942_s11 }
  0x29   :  { %p679_p4 = pnand %p677_p3, %p674_p2 }
  0x2b   :  { %682 = shalt.err (!%p679_p4)
}
  0x2c   :  { %s683_s23 = scalar_lea.vmem %s69_s21, 512  ;;  %p688_p6 = scmp.lt.s32.totalorder %s69_s21, %s69_s21 }
  0x2d   :  { %p684_p5 = scmp.ne.s32.totalorder %s69_s21, %s683_s23  ;;  %p689_p7 = scmp.lt.s32.totalorder %s683_s23, %s683_s23 }
  0x2f   :  { %p690_p8 = por %p689_p7, %p688_p6 }
  0x31   :  { %p691_p9 = pnand %p690_p8, %p684_p5 }
  0x33   :  { %694 = shalt.err (!%p691_p9)
}
  0x34   :  { %s728_s0 = smov 128   ;;  %s729_s18 = smov 8  }
  0x35   :  { %74 = dma.hbm_to_vmem [thread:$0]  %s942_s11, 512, %s69_s21, [#allocation6], %s728_s0, %s728_s0, %s729_s18  }
  0x36   :  { %717 = dma.done.wait [#allocation3], 32  }
  0x37   :  { %718 = vsyncadd [#allocation3], 4294967264 }
  0x38   :  { %719 = dma.done.wait [#allocation6], 1536  }
  0x39   :  { %720 = vsyncadd [#allocation6], 4294965760  ;;  %v730_v0 = vmov 0.0   ;;  %vm731_vm0 = vmmov 0   ;;  %v732_v1 = vmov 0.0|0.0   ;;  %vm99_vm1 = vcmask 64512  }
  0x3a   :  { %560 = vmatprep.subr.mxu0 %v730_v0  ;;  %562 = vmatprep.mubr.msk.f32.mxu0 %vm731_vm0, %v730_v0  ;;  %v91_v2 = vld [vmem:[%s936_s5] sm:$0xff]  ;;  %v175_v5 = vld [vmem:[%s938_s7 + $0x8] sm:$0xff]  ;;  %v176_v7 = vld [vmem:[%s938_s7 + $0x10] sm:$0xff]  ;;  %vm185_vm2 = vcmask 261120   ;;  %v733_v35 = vmov 0   ;;  %v270_v43 = vlaneseq  ;;  %vm510_vm12 = vcmask 1041408  }
  0x3b   :  { %587 = vmatprep.subr.bf16.mxu1 %v732_v1  ;;  %573 = vmatprep.mubr.msk.f32.mxu1 %vm731_vm0, %v730_v0  ;;  %v90_v3 = vld [vmem:[#allocation2] sm:$0x3]  ;;  %v177_v8 = vld [vmem:[%s938_s7 + $0x18] sm:$0xff]  ;;  %v261_v10 = vld [vmem:[#allocation5 + $0x8] sm:$0xff] }
  0x3c   :  { %v174_v4 = vld [vmem:[%s938_s7] sm:$0xff]  ;;  %561 = vmatpush3.msra.mxu0 %v91_v2  ;;  %v591_v9 = vpack.c.bf16 %v177_v8, %v176_v7  ;;  %v262_v14 = vld [vmem:[#allocation5 + $0x10] sm:$0xff]  ;;  %v355_v18 = vld [vmem:[#allocation7 + $0x8] sm:$0xff]  ;;  %619 = vset.pattern.permute.xlu0 %v733_v35  ;;  %v271_v44 = vshrl.u32 %v270_v43, 7  ;;  %v893_v47 = vand.u32 127, %v270_v43 }
  0x3d   :  { %563 = vmatmul.mubr.msk.f32.vlgmr.msra.gmra.mrb[0].mxu0 %vm99_vm1, %v90_v3  ;;  %v588_v6 = vpack.c.bf16 %v175_v5, %v174_v4  ;;  %v263_v11 = vld [vmem:[#allocation5 + $0x18] sm:$0xff]  ;;  %v260_v12 = vld [vmem:[#allocation5] sm:$0xff]  ;;  %v265_v24 = vld [vmem:[#allocation5 + $0x28] sm:$0xff]  ;;  %620 = vset.pattern.permute.xlu1 %v733_v35 }
  0x3e   :  { %347 = vmatprep.mubr.f32.mxu0 %v730_v0  ;;  %v593_v13 = vpack.c.bf16 %v263_v11, %v261_v10  ;;  %v595_v15 = vpack.c.bf16 %v262_v14, %v260_v12  ;;  %v538_v16 = vld [vmem:[%s937_s6] ss:$0 sm:$0xff]  ;;  %v354_v17 = vld [vmem:[#allocation7] sm:$0xff]  ;;  %v266_v28 = vld [vmem:[#allocation5 + $0x30] sm:$0xff]  ;;  %v276_v45 = vsub.s32 1, %v271_v44  ;;  %vm437_vm3 = vcmp.lt.s32.totalorder %v893_v47, 8 }
  0x3f   :  { %589 = vmatpush3.bf16.msra.mxu1 %v588_v6  ;;  %v602_v22 = vpack.c.bf16 %v355_v18, %v354_v17  ;;  %v267_v25 = vld [vmem:[#allocation5 + $0x38] sm:$0xff]  ;;  %v264_v27 = vld [vmem:[#allocation5 + $0x20] sm:$0xff]  ;;  %v356_v29 = vld [vmem:[#allocation7 + $0x10] sm:$0xff]  ;;  %vm449_vm4 = vcmp.eq.s32.totalorder %v893_v47, 0  ;;  %vm457_vm5 = vcmp.eq.s32.totalorder %v893_v47, 1  ;;  %vm465_vm6 = vcmp.eq.s32.totalorder %v893_v47, 2 }
  0x40   :  { %590 = vmatprep.subr.bf16.mxu1 %v732_v1  ;;  %594 = vmatprep.subr.bf16.mxu0 %v593_v13  ;;  %v597_v26 = vpack.c.bf16 %v267_v25, %v265_v24  ;;  %v599_v30 = vpack.c.bf16 %v266_v28, %v264_v27  ;;  %v357_v31 = vld [vmem:[#allocation7 + $0x18] sm:$0xff]  ;;  %vm473_vm7 = vcmp.eq.s32.totalorder %v893_v47, 3  ;;  %vm515_vm8 = vcmp.ge.s32.totalorder %v893_v47, 8 }
  0x41   :  { %596 = vmatpush1.bf16.msra.mxu0 %v595_v15  ;;  %v605_v32 = vpack.c.bf16 %v357_v31, %v356_v29  ;;  %v443_v33 = vld [vmem:[%s932_s1] sm:$0x3]  ;;  %vm516_vm9 = vcmp.lt.s32.totalorder %v893_v47, 12  ;;  %vm508_vm10 = vcmp.lt.s32.totalorder %v893_v47, 4  ;;  %vm519_vm13 = vcmp.eq.s32.totalorder %v893_v47, 12 }
  0x42   :  { %598 = vmatprep.subr.bf16.mxu0 %v597_v26  ;;  %v459_v34 = vld [vmem:[%s934_s3] sm:$0x3]  ;;  %446 = vperm.xlu0 %619, %v443_v33   ;;  %vm912_vm11 = vmand %vm515_vm8, %vm516_vm9 }
  0x43   :  { %592 = vmatpush3.bf16.msra.mxu1 %v591_v9  ;;  %462 = vperm.xlu1 %620, %v459_v34   ;;  %v451_v36 = vld [vmem:[%s933_s2] sm:$0x3] }
  0x44   :  { %601 = vmatprep.subr.bf16.mxu1 %v732_v1  ;;  %v467_v37 = vld [vmem:[%s935_s4] sm:$0x3] }
  0x45   :  { %600 = vmatpush1.bf16.msra.mxu0 %v599_v30  ;;  %v540_v38 = vld [vmem:[%s939_s8] ss:$0 sm:$0xff] }
  0x46   :  { %454 = vperm.xlu0 %619, %v451_v36   ;;  %v268_v46 = vld [vmem:[%s941_s10] sm:$0x3] }
  0x47   :  { %470 = vperm.xlu1 %620, %v467_v37   ;;  %v543_v48 = vld [vmem:[%s943_s12] ss:$0 sm:$0xff]  ;;  %v277_v49 = vrot.slane %v268_v46, %v276_v45 }
  0x48   :  { %v545_v13 = vld [vmem:[%s944_s13] ss:$0 sm:$0xff]  ;;  %s734_s13 = smov [#allocation8]  }
  0xc1   :  { %v447_v58 = vpop.permute.xlu0 %446 }
  0xc2   :  { %v450_v61 = vsel %vm449_vm4, %v447_v58, 0.0  ;;  %v463_v62 = vpop.permute.xlu1 %462 }
  0xc5   :  { %v455_v63 = vpop.permute.xlu0 %454 }
  0xc6   :  { %v471_v3 = vpop.permute.xlu1 %470 }
 0x110   :  { %v169_v19 = vpop.f32.mrb[0].mxu0 }
 0x111   :  { %v170_v20 = vadd.f32 %v538_v16, %v169_v19  ;;  %v564_v21 = vpop.f32.mrb[1].mxu0  ;;  %v546_v16 = vld [vmem:[%s945_s14] ss:$0 sm:$0xff]  ;;  %s528_s14 = sshll.u32 %s734_s13, 4  ;;  %s529_s14 = int_to_ptr.vmem [resolvable:$true] %s528_s14 }
 0x112   :  { %s695_s27 = scalar_lea.vmem %s529_s14, 32  ;;  %p700_p11 = scmp.lt.s32.totalorder %s529_s14, %s529_s14 }
 0x113   :  { %v173_v23 = vmax.f32 %v170_v20, 0.0  ;;  %p696_p10 = scmp.ne.s32.totalorder %s529_s14, %s695_s27  ;;  %p701_p12 = scmp.lt.s32.totalorder %s695_s27, %s695_s27 }
 0x115   :  { %574 = vmatmul.mubr.msk.f32.vlgmr.msra.gmra.mrb[0].mxu1 %vm185_vm2, %v173_v23  ;;  %p702_p13 = por %p701_p12, %p700_p11 }
 0x116   :  { %603 = vmatpush3.bf16.msra.mxu1 %v602_v22  ;;  %584 = vmatprep.mubr.msk.f32.mxu1 %vm731_vm0, %v730_v0  ;;  %v272_v0 = vsub.s32 0, %v271_v44 }
 0x117   :  { %604 = vmatprep.subr.bf16.mxu1 %v732_v1  ;;  %v458_v1 = vsel %vm457_vm5, %v455_v63, %v450_v61  ;;  %p703_p0 = pnand %p702_p13, %p696_p10 }
 0x118   :  { %v273_v2 = vrot.slane %v268_v46, %v272_v0  ;;  %v466_v4 = vsel %vm465_vm6, %v463_v62, %v458_v1 }
 0x119   :  { %v474_v6 = vsel %vm473_vm7, %v471_v3, %v466_v4 }
 0x11a   :  { %606 = vmatpush3.bf16.msra.mxu1 %v605_v32 }
 0x1e8   :  { %v255_v39 = vpop.f32.mrb[0].mxu1 }
 0x1e9   :  { %v256_v40 = vadd.f32 %v540_v38, %v255_v39  ;;  %v575_v41 = vpop.f32.mrb[1].mxu1 }
 0x1eb   :  { %v259_v42 = vmax.f32 %v256_v40, 0.0 }
 0x1ed   :  { %542 = vmatmul.mubr.msk.f32.vlgmr.msra.gmra.mrb[2].mxu0 %vm185_vm2, %v259_v42  ;;  %585 = vmatmul.mubr.msk.f32.vlgmr.msra.gmra.mrb[2].mxu1 %vm185_vm2, %v259_v42 }
 0x2c0   :  { %v349_v50 = vpop.f32.mrb[2].mxu0  ;;  %v431_v51 = vpop.f32.mrb[2].mxu1 }
 0x2c1   :  { %v432_v52 = vadd.f32 %v543_v48, %v431_v51  ;;  %v351_v53 = vpop.f32.mrb[3].mxu0  ;;  %v586_v54 = vpop.f32.mrb[3].mxu1  ;;  %v350_v7 = vadd.f32 %v349_v50, %v273_v2 }
 0x2c2   :  { %v352_v55 = vadd.f32 %v351_v53, %v277_v49 }
 0x2c4   :  { %v438_v56 = vsel %vm437_vm3, %v352_v55, %v432_v52 }
 0x2c5   :  { %v439_v57 = vmax.f32 %v438_v56, -4.0 }
 0x2c7   :  { %v440_v59 = vmin.f32 %v439_v57, 2.0 }
 0x2c9   :  { %v441_v60 = vmul.f32 1.442695, %v440_v59 }
 0x2cb   :  { %621 = vpow2.f32 %v441_v60 }
 0x2d5   :  { %v622_v5 = vpop.eup %621 }
 0x2d6   :  { %v475_v8 = vmul.f32 %v622_v5, %v474_v6  ;;  %623 = vrcp.f32 %v622_v5 }
 0x2d8   :  { %v476_v9 = vadd.f32 %v475_v8, %v350_v7 }
 0x2da   :  { %v477_v10 = vsub.f32 %v476_v9, %v350_v7  ;;  %625 = vtanh.f32 %v476_v9 }
 0x2e0   :  { %v624_v11 = vpop.eup %623 }
 0x2e1   :  { %v479_v12 = vmul.f32 %v624_v11, %v477_v10 }
 0x2e3   :  { %v497_v14 = vmul.f32 -0.5, %v479_v12 }
 0x2e4   :  { %v626_v15 = vpop.eup %625 }
 0x2e5   :  { %v488_v17 = vmul.f32 %v626_v15, %v545_v13  ;;  %v498_v18 = vmul.f32 %v497_v14, %v479_v12  ;;  %v501_v19 = vmul.f32 %v626_v15, %v626_v15 }
 0x2e7   :  { %v496_v20 = vadd.f32 %v546_v16, %v488_v17  ;;  %v499_v21 = vsub.f32 %v498_v18, %v440_v59  ;;  %v502_v22 = vsub.f32 1.0, %v501_v19 }
 0x2e9   :  { %v503_v24 = vmul.f32 %v545_v13, %v502_v22  ;;  %v514_v25 = vsel %vm508_vm10, %v496_v20, %v432_v52  ;;  %v547_v29 = vadd.f32 -0.9189385, %v499_v21 }
 0x2ea   :  { %v518_v26 = vsel %vm912_vm11, %v622_v5, %v514_v25 }
 0x2eb   :  { %v504_v27 = vadd.f32 1e-06, %v503_v24 }
 0x2ed   :  { %627 = vlog2.f32 %v504_v27 }
 0x2f7   :  { %v628_v28 = vpop.eup %627 }
 0x2f8   :  { %v506_v30 = vmul.f32 0.6931472, %v628_v28 }
 0x2fa   :  { %v507_v31 = vsub.f32 %v547_v29, %v506_v30 }
 0x2fc   :  { %v509_v32 = vsel %vm508_vm10, %v507_v31, 0.0 }
 0x2fd   :  { %v511_v33 = vsel %vm510_vm12, %v509_v32, 0.0 }
 0x2fe   :  { %512 = vadd.xlane.f32.xlu0 %v511_v33 }
 0x38b   :  { %v513_v34 = vpop.xlane.xlu0 %512 }
 0x38c   :  { %v520_v35 = vsel %vm519_vm13, %v513_v34, %v518_v26 }
 0x38d   :  { %521 = vst [vmem:[#allocation8] sm:$0x3] %v520_v35 }
 0x38e   :  { %706 = shalt.err (!%p703_p0)
}
 0x38f   :  { %s951_s9 = sld [smem:[#allocation12_spill]] }
 0x395   :  { %s707_s19 = scalar_lea.hbm %s951_s9, 32 }
 0x396   :  { %p708_p1 = scmp.ne.s32.totalorder %s951_s9, %s707_s19  ;;  %p711_p2 = scmp.lt.u32.totalorder %s707_s19, %s951_s9 }
 0x398   :  { %p713_p3 = pnand %p711_p2, %p708_p1 }
 0x39a   :  { %716 = shalt.err (!%p713_p3)
}
 0x39b   :  { %531 = dma.vmem_to_hbm [thread:$0]  %s529_s14, 32, %s951_s9, [#allocation4]  }
 0x39c   :  { %721 = dma.done.wait [#allocation4], 32  }
 0x39d   :  { %722 = vsyncadd [#allocation4], 4294967264 }
 0x39e   :  { %535 = vsyncpa [#allocation3], 1 }
 0x39f   :  { %536 = vsyncpa [#allocation6], 1 }
 0x3a0   :  { %537 = vsyncpa [#allocation4], 1 }

</bundles_post_ra>
